<compile_context>
chip_gen: v7x
topology: tpu7x:2x2x1
jax: 0.10.0
libtpu: 0.0.40
codegen_flags: <defaults>
</compile_context>

<pallas_src>
import jax
import jax.numpy as jnp
from jax import lax
from jax.experimental import pallas as pl
from jax.experimental.pallas import tpu as pltpu

_LANES = 128


def _round_up(x, m):
    return ((x + m - 1) // m) * m


def mlp_critic_kernel(x_ref, w1_ref, b1_ref, w2_ref, b2_ref, w3_ref, b3_ref, o_ref):
    # One batch tile per grid step; the three layers are fused in VMEM.
    w1 = w1_ref[...]
    w2 = w2_ref[...]
    w3 = w3_ref[...]                            # (1, H2) row
    # Read biases once; keep all elementwise work in f32 (v5e has no bf16 VPU).
    b1 = b1_ref[...].astype(jnp.float32)
    b2 = b2_ref[...].astype(jnp.float32)
    b3 = b3_ref[...].astype(jnp.float32)        # (1, 1)

    # Single read + single cast of the x tile.
    x = x_ref[...].astype(w1.dtype)

    h1 = jnp.dot(x, w1, preferred_element_type=jnp.float32) + b1
    h1 = jnp.maximum(h1, 0.0)

    h2 = jnp.dot(h1.astype(w2.dtype), w2, preferred_element_type=jnp.float32) + b2
    h2 = jnp.maximum(h2, 0.0)

    # Final layer as a (1, TB) row: contract w3_row (1, H2) with h2 (TB, H2)
    # along the feature dim (A @ B.T style).  Output is lane-dense over batch,
    # so the HBM writeback is tb*4 bytes per step instead of tb*128*4.
    out = lax.dot_general(
        w3, h2.astype(w3.dtype),
        dimension_numbers=(((1,), (1,)), ((), ())),
        preferred_element_type=jnp.float32,
    ) + b3
    o_ref[...] = out.astype(o_ref.dtype)


def net_forward(x, params, *, block_batch=4096):
    """x: [B, n_states].  params: dict of (w1,b1,w2,b2,w3,b3).  Returns [B, 1] f32."""
    w1, b1 = params["w1"], params["b1"]
    w2, b2 = params["w2"], params["b2"]
    w3, b3 = params["w3"], params["b3"]          # w3: (1, H2) row, b3: (1, 1)

    B, n_states = x.shape
    H1 = w1.shape[1]
    H2 = w2.shape[1]

    # Low-precision weights (v6e/v7x): feed x in the same dtype to halve the
    # dominant HBM read; accumulation stays f32 inside the kernel.
    if w1.dtype != jnp.float32:
        x = x.astype(w1.dtype)

    # Batch tiling: lane-dense (multiple-of-128) tiles.  Cap tb at ~ceil(B/2)
    # so large batches get >= 2 grid steps ("parallel" axis -> both v7x
    # TensorCores); cap at block_batch so the double-buffered lane-padded x
    # tile + f32 intermediates stay inside the 32 MiB scoped-VMEM budget.
    block_batch = max(_LANES, _round_up(block_batch, _LANES))
    tb = min(block_batch, max(_LANES, _round_up(-(-B // 2), _LANES)))
    b_padded = _round_up(B, tb)
    if b_padded != B:
        x = jnp.pad(x, ((0, b_padded - B), (0, 0)))
    grid = (b_padded // tb,)

    x_spec = pl.BlockSpec((tb, n_states), lambda i: (i, 0))
    full = lambda a: pl.BlockSpec(a.shape, lambda i: (0, 0))
    out_spec = pl.BlockSpec((1, tb), lambda i: (0, i))

    itemsize = lambda a: a.size * a.dtype.itemsize
    flops = 2 * b_padded * (n_states * H1 + H1 * H2 + H2 * 1)
    bytes_accessed = (
        itemsize(x)                                               # x read
        + sum(itemsize(a) for a in (w1, b1, w2, b2, w3, b3))      # resident weights
        + b_padded * 4                                            # lane-dense output
    )

    out = pl.pallas_call(
        mlp_critic_kernel,
        out_shape=jax.ShapeDtypeStruct((1, b_padded), jnp.float32),
        grid=grid,
        in_specs=[x_spec, full(w1), full(b1), full(w2), full(b2), full(w3), full(b3)],
        out_specs=out_spec,
        compiler_params=pltpu.CompilerParams(
            dimension_semantics=("parallel",),
            vmem_limit_bytes=32 * 1024 * 1024,
        ),
        cost_estimate=pl.CostEstimate(
            flops=flops, transcendentals=0, bytes_accessed=bytes_accessed
        ),
    )(x, w1, b1, w2, b2, w3, b3)

    # (1, b_padded) row -> [B, 1]; drops batch padding, no strided lane slice.
    return out[0, :B, None]


def init_params(key, n_states, n_hidden_1=64, n_hidden_2=64, dtype=jnp.float32):
    """Deterministic init mimicking nn.Linear's U(-1/sqrt(fan_in), 1/sqrt(fan_in)).

    Hidden weights are stored as [in_features, out_features]; the output layer
    is pre-packed as a (1, n_hidden_2) row so the kernel can emit a lane-dense
    (1, TB) output.  Use dtype=jnp.bfloat16 on v6e/v7x to halve weight/x DMA
    bytes (dots still accumulate in f32)."""
    ks = jax.random.split(key, 6)

    def linear(kw, kb, fan_in, fan_out):
        bound = 1.0 / jnp.sqrt(jnp.float32(fan_in))
        w = jax.random.uniform(kw, (fan_in, fan_out), jnp.float32, -bound, bound)
        b = jax.random.uniform(kb, (1, fan_out), jnp.float32, -bound, bound)
        return w.astype(dtype), b.astype(dtype)

    w1, b1 = linear(ks[0], ks[1], n_states, n_hidden_1)
    w2, b2 = linear(ks[2], ks[3], n_hidden_1, n_hidden_2)
    w3_col, b3 = linear(ks[4], ks[5], n_hidden_2, 1)
    w3 = w3_col.T                                 # (1, n_hidden_2) row
    return {"w1": w1, "b1": b1, "w2": w2, "b2": b2, "w3": w3, "b3": b3}


def _reference(x, params):
    f32 = lambda a: a.astype(jnp.float32)
    h = jnp.maximum(f32(x) @ f32(params["w1"]) + f32(params["b1"]), 0.0)
    h = jnp.maximum(h @ f32(params["w2"]) + f32(params["b2"]), 0.0)
    return h @ f32(params["w3"]).T + f32(params["b3"])


if __name__ == "__main__":
    key = jax.random.PRNGKey(0)
    k_x, k_x2, k_p = jax.random.split(key, 3)

    n_states = 8  # e.g. LunarLander observation dim
    params = init_params(k_p, n_states)

    # Small single-tile case (grid=(1,), batch padded to one 128-row tile).
    batch = 8
    x = jax.random.normal(k_x, (batch, n_states), dtype=jnp.float32)
    y = jax.block_until_ready(net_forward(x, params))
    assert y.shape == (batch, 1)
    assert jnp.allclose(y, _reference(x, params), atol=1e-4, rtol=1e-4)

    # Multi-tile case exercising the batch grid + padding (B not a tile multiple).
    batch2 = 200
    x2 = jax.random.normal(k_x2, (batch2, n_states), dtype=jnp.float32)
    y2 = jax.block_until_ready(net_forward(x2, params, block_batch=128))
    assert y2.shape == (batch2, 1)
    assert jnp.allclose(y2, _reference(x2, params), atol=1e-4, rtol=1e-4)

    print("KERNEL_OK")
</pallas_src>

<mosaic_0001>
module attributes {stable_mosaic.version = 11 : i64} {
  func.func @mlp_critic_kernel(%arg0: i32, %arg1: memref<128x8xf32, #tpu.memory_space<vmem>>, %arg2: memref<8x64xf32, #tpu.memory_space<vmem>>, %arg3: memref<1x64xf32, #tpu.memory_space<vmem>>, %arg4: memref<64x64xf32, #tpu.memory_space<vmem>>, %arg5: memref<1x64xf32, #tpu.memory_space<vmem>>, %arg6: memref<1x64xf32, #tpu.memory_space<vmem>>, %arg7: memref<1x1xf32, #tpu.memory_space<vmem>>, %arg8: memref<1x128xf32, #tpu.memory_space<vmem>>) attributes {dimension_semantics = [#tpu.dimension_semantics<parallel>], iteration_bounds = array<i64: 1>, scalar_prefetch = 0 : i64, scratch_operands = 0 : i64, tpu.core_type = #tpu.core_type<tc>, window_params = [{transform_indices = @transform_0, window_bounds = array<i64: 128, 8>}, {pipeline_mode = #tpu.pipeline_mode<synchronous>, transform_indices = @transform_1, window_bounds = array<i64: 8, 64>}, {pipeline_mode = #tpu.pipeline_mode<synchronous>, transform_indices = @transform_2, window_bounds = array<i64: 1, 64>}, {pipeline_mode = #tpu.pipeline_mode<synchronous>, transform_indices = @transform_3, window_bounds = array<i64: 64, 64>}, {pipeline_mode = #tpu.pipeline_mode<synchronous>, transform_indices = @transform_4, window_bounds = array<i64: 1, 64>}, {pipeline_mode = #tpu.pipeline_mode<synchronous>, transform_indices = @transform_5, window_bounds = array<i64: 1, 64>}, {pipeline_mode = #tpu.pipeline_mode<synchronous>, transform_indices = @transform_6, window_bounds = array<i64: 1, 1>}, {transform_indices = @transform_7, window_bounds = array<i64: 1, 128>}]} {
    %c0 = arith.constant 0 : index
    %c0_0 = arith.constant 0 : index
    %0 = vector.load %arg2[%c0, %c0_0] : memref<8x64xf32, #tpu.memory_space<vmem>>, vector<8x64xf32>
    %c0_1 = arith.constant 0 : index
    %c0_2 = arith.constant 0 : index
    %1 = vector.load %arg4[%c0_1, %c0_2] : memref<64x64xf32, #tpu.memory_space<vmem>>, vector<64x64xf32>
    %c0_3 = arith.constant 0 : index
    %c0_4 = arith.constant 0 : index
    %2 = vector.load %arg6[%c0_3, %c0_4] : memref<1x64xf32, #tpu.memory_space<vmem>>, vector<1x64xf32>
    %c0_5 = arith.constant 0 : index
    %c0_6 = arith.constant 0 : index
    %3 = vector.load %arg3[%c0_5, %c0_6] : memref<1x64xf32, #tpu.memory_space<vmem>>, vector<1x64xf32>
    %c0_7 = arith.constant 0 : index
    %c0_8 = arith.constant 0 : index
    %4 = vector.load %arg5[%c0_7, %c0_8] : memref<1x64xf32, #tpu.memory_space<vmem>>, vector<1x64xf32>
    %c0_9 = arith.constant 0 : index
    %c0_10 = arith.constant 0 : index
    %5 = vector.load %arg7[%c0_9, %c0_10] : memref<1x1xf32, #tpu.memory_space<vmem>>, vector<1x1xf32>
    %c0_11 = arith.constant 0 : index
    %c0_12 = arith.constant 0 : index
    %6 = vector.load %arg1[%c0_11, %c0_12] : memref<128x8xf32, #tpu.memory_space<vmem>>, vector<128x8xf32>
    %cst = arith.constant dense<0.000000e+00> : vector<128x64xf32>
    %7 = tpu.matmul %6, %0, %cst {dimension_numbers = #tpu.dot_dimension_numbers<[1], [0], [0], [1], [0, 0, 1, 1], [], []>} : vector<128x8xf32>, vector<8x64xf32>, vector<128x64xf32> -> vector<128x64xf32>
    %8 = vector.broadcast %3 : vector<1x64xf32> to vector<128x64xf32>
    %9 = arith.addf %7, %8 : vector<128x64xf32>
    %cst_13 = arith.constant 0.000000e+00 : f32
    %10 = vector.broadcast %cst_13 : f32 to vector<128x64xf32>
    %11 = arith.maximumf %9, %10 : vector<128x64xf32>
    %cst_14 = arith.constant dense<0.000000e+00> : vector<128x64xf32>
    %12 = tpu.matmul %11, %1, %cst_14 {dimension_numbers = #tpu.dot_dimension_numbers<[1], [0], [0], [1], [0, 0, 1, 1], [], []>} : vector<128x64xf32>, vector<64x64xf32>, vector<128x64xf32> -> vector<128x64xf32>
    %13 = vector.broadcast %4 : vector<1x64xf32> to vector<128x64xf32>
    %14 = arith.addf %12, %13 : vector<128x64xf32>
    %cst_15 = arith.constant 0.000000e+00 : f32
    %15 = vector.broadcast %cst_15 : f32 to vector<128x64xf32>
    %16 = arith.maximumf %14, %15 : vector<128x64xf32>
    %cst_16 = arith.constant dense<0.000000e+00> : vector<1x128xf32>
    %17 = tpu.matmul %2, %16, %cst_16 {dimension_numbers = #tpu.dot_dimension_numbers<[1], [1], [0], [0], [0, 0, 1, 0], [], []>} : vector<1x64xf32>, vector<128x64xf32>, vector<1x128xf32> -> vector<1x128xf32>
    %18 = vector.broadcast %5 : vector<1x1xf32> to vector<1x128xf32>
    %19 = arith.addf %17, %18 : vector<1x128xf32>
    %c0_17 = arith.constant 0 : index
    %c0_18 = arith.constant 0 : index
    %20 = vector.load %arg8[%c0_17, %c0_18] : memref<1x128xf32, #tpu.memory_space<vmem>>, vector<1x128xf32>
    tpu.vector_store %arg8[%c0_17, %c0_18], %19 {strides = array<i32>} : memref<1x128xf32, #tpu.memory_space<vmem>>, vector<1x128xf32>,
    return
  }
  func.func @transform_0(%arg0: i32) -> (i32, i32) {
    %c0_i32 = arith.constant 0 : i32
    %c0_i32_0 = arith.constant 0 : i32
    return %arg0, %c0_i32 : i32, i32
  }
  func.func @transform_1(%arg0: i32) -> (i32, i32) {
    %c0_i32 = arith.constant 0 : i32
    %c0_i32_0 = arith.constant 0 : i32
    %c0_i32_1 = arith.constant 0 : i32
    return %c0_i32, %c0_i32_0 : i32, i32
  }
  func.func @transform_2(%arg0: i32) -> (i32, i32) {
    %c0_i32 = arith.constant 0 : i32
    %c0_i32_0 = arith.constant 0 : i32
    %c0_i32_1 = arith.constant 0 : i32
    return %c0_i32, %c0_i32_0 : i32, i32
  }
  func.func @transform_3(%arg0: i32) -> (i32, i32) {
    %c0_i32 = arith.constant 0 : i32
    %c0_i32_0 = arith.constant 0 : i32
    %c0_i32_1 = arith.constant 0 : i32
    return %c0_i32, %c0_i32_0 : i32, i32
  }
  func.func @transform_4(%arg0: i32) -> (i32, i32) {
    %c0_i32 = arith.constant 0 : i32
    %c0_i32_0 = arith.constant 0 : i32
    %c0_i32_1 = arith.constant 0 : i32
    return %c0_i32, %c0_i32_0 : i32, i32
  }
  func.func @transform_5(%arg0: i32) -> (i32, i32) {
    %c0_i32 = arith.constant 0 : i32
    %c0_i32_0 = arith.constant 0 : i32
    %c0_i32_1 = arith.constant 0 : i32
    return %c0_i32, %c0_i32_0 : i32, i32
  }
  func.func @transform_6(%arg0: i32) -> (i32, i32) {
    %c0_i32 = arith.constant 0 : i32
    %c0_i32_0 = arith.constant 0 : i32
    %c0_i32_1 = arith.constant 0 : i32
    return %c0_i32, %c0_i32_0 : i32, i32
  }
  func.func @transform_7(%arg0: i32) -> (i32, i32) {
    %c0_i32 = arith.constant 0 : i32
    %c0_i32_0 = arith.constant 0 : i32
    return %c0_i32, %arg0 : i32, i32
  }
}

</mosaic_0001>

<bundles_post_ra>
// kernel: tpu_custom_call.1
= control target key start
LH: loop header
LB: loop body
LE: loop exit
PB: predicated region body
PF: predicated region fallthrough
CT: control target
= control target key end

     0   :  { %s1130_s0 = inlined_call_operand.vmem [shape: f32[128,8], index: 0, kind: input, shape index: {}]   ;;  %s1131_s1 = inlined_call_operand.vmem [shape: f32[8,64], index: 1, kind: input, shape index: {}]   ;;  %s1132_s2 = inlined_call_operand.vmem [shape: f32[1,64], index: 2, kind: input, shape index: {}]   ;;  %s1133_s3 = inlined_call_operand.vmem [shape: f32[64,64], index: 3, kind: input, shape index: {}]   ;;  %s1134_s4 = inlined_call_operand.vmem [shape: f32[1,64], index: 4, kind: input, shape index: {}]   ;;  %s1135_s5 = inlined_call_operand.vmem [shape: f32[1,64], index: 5, kind: input, shape index: {}]   ;;  %s1136_s6 = inlined_call_operand.<no memory space> [shape: f32[1,1], index: 6, kind: input, shape index: {}]   ;;  %s1137_s7 = inlined_call_operand.hbm [shape: f32[1,128], index: 7, kind: output, shape index: {}]  }
   0x1   :  { %v12_v0 = vstv %s1136_s6 }
   0x2   :  { %13 = vst [vmem:[#allocation2] sm:$0x1] %v12_v0 }
   0x3   :  { %v29_v1 = vld [vmem:[%s1131_s1] sm:$0xff]  ;;  %vm64_vm0 = vcmask 64512   ;;  %v43_v3 = vld [vmem:[%s1130_s0 + $0x8] sm:$0xff]  ;;  %v44_v4 = vld [vmem:[%s1130_s0 + $0x10] sm:$0xff] }
   0x4   :  { %v42_v2 = vld [vmem:[%s1130_s0] sm:$0xff]  ;;  %744 = vmatprep.subr.mxu1 %v29_v1  ;;  %v45_v5 = vld [vmem:[%s1130_s0 + $0x18] sm:$0xff]  ;;  %v31_v8 = vld [vmem:[%s1133_s3 + $0x8] sm:$0xff] }
   0x5   :  { %746 = vmatprep.mubr.msk.f32.mxu1 %vm64_vm0, %v42_v2  ;;  %745 = vmatpush3.msra.mxu1 %v29_v1  ;;  %v46_v6 = vld [vmem:[%s1130_s0 + $0x20] sm:$0xff]  ;;  %v32_v9 = vld [vmem:[%s1133_s3 + $0x10] sm:$0xff]  ;;  %v33_v10 = vld [vmem:[%s1133_s3 + $0x18] sm:$0xff] }
   0x6   :  { %747 = vmatmul.mubr.msk.f32.vlgmr.msra.gmra.mrb[0].mxu1 %vm64_vm0, %v43_v3  ;;  %v30_v7 = vld [vmem:[%s1133_s3] sm:$0xff]  ;;  %v47_v11 = vld [vmem:[%s1130_s0 + $0x28] sm:$0xff]  ;;  %v849_v13 = vpack.c.bf16 %v33_v10, %v32_v9 }
   0x7   :  { %749 = vmatprep.mubr.msk.f32.mxu1 %vm64_vm0, %v44_v4  ;;  %v845_v12 = vpack.c.bf16 %v31_v8, %v30_v7  ;;  %v34_v14 = vld [vmem:[%s1133_s3 + $0x20] sm:$0xff]  ;;  %v35_v15 = vld [vmem:[%s1133_s3 + $0x28] sm:$0xff] }
   0xa   :  { %750 = vmatmul.mubr.msk.f32.gmra.mrb[2].mxu1 %vm64_vm0, %v45_v5 }
   0xb   :  { %752 = vmatprep.mubr.msk.f32.mxu1 %vm64_vm0, %v46_v6 }
   0xc   :  { %14 = vsyncpa [#allocation4], 0  ;;  %v48_v16 = vld [vmem:[%s1130_s0 + $0x30] sm:$0xff]  ;;  %846 = vmatprep.subr.bf16.mxu1 %v845_v12  ;;  %v853_v17 = vpack.c.bf16 %v35_v15, %v34_v14  ;;  %v49_v18 = vld [vmem:[%s1130_s0 + $0x38] sm:$0xff]  ;;  %vm280_vm1 = vcmask 523264   ;;  %v923_v15 = vmov 0.0|0.0  }
   0xd   :  { %848 = vmatpush3.bf16.msra.mxu1 %v845_v12  ;;  %v36_v19 = vld [vmem:[%s1133_s3 + $0x30] sm:$0xff]  ;;  %v37_v20 = vld [vmem:[%s1133_s3 + $0x38] sm:$0xff]  ;;  %v50_v21 = vld [vmem:[%s1130_s0 + $0x40] sm:$0xff]  ;;  %861 = vmatprep.subr.bf16.mxu0 %v923_v15  ;;  %vm924_vm2 = vmmov 0   ;;  %s927_s28 = smov [#allocation3]  }
   0xe   :  { %753 = vmatmul.mubr.msk.f32.gmra.mrb[4].mxu1 %vm64_vm0, %v47_v11  ;;  %850 = vmatprep.subr.bf16.mxu1 %v849_v13  ;;  %v857_v22 = vpack.c.bf16 %v37_v20, %v36_v19  ;;  %v51_v23 = vld [vmem:[%s1130_s0 + $0x48] sm:$0xff]  ;;  %v52_v24 = vld [vmem:[%s1130_s0 + $0x50] sm:$0xff]  ;;  %v53_v25 = vld [vmem:[%s1130_s0 + $0x58] sm:$0xff]  ;;  %s627_s29 = sshll.u32 %s927_s28, 4  ;;  %s628_s29 = int_to_ptr.vmem [resolvable:$true] %s627_s29 }
   0xf   :  { %755 = vmatprep.mubr.msk.f32.mxu1 %vm64_vm0, %v48_v16  ;;  %v54_v26 = vld [vmem:[%s1130_s0 + $0x60] sm:$0xff]  ;;  %v55_v27 = vld [vmem:[%s1130_s0 + $0x68] sm:$0xff]  ;;  %v56_v28 = vld [vmem:[%s1130_s0 + $0x70] sm:$0xff]  ;;  %v925_v16 = vmov 0.0   ;;  %s899_s30 = scalar_lea.vmem %s628_s29, 16  ;;  %s903_s8 = scalar_lea.vmem %s628_s29, 32 }
  0x10   :  { %v57_v29 = vld [vmem:[%s1130_s0 + $0x78] sm:$0xff]  ;;  %v635_v30 = vld [vmem:[%s1132_s2] ss:$0 sm:$0xff]  ;;  %842 = vmatprep.mubr.msk.f32.mxu0 %vm924_vm2, %v925_v16  ;;  %vm1087_vm3 = vmpackc.low %vm280_vm1, %vm280_vm1  ;;  %p900_p0 = scmp.ne.s32.totalorder %s628_s29, %s899_s30  ;;  %p904_p1 = scmp.lt.s32.totalorder %s628_s29, %s628_s29 }
  0x11   :  { %852 = vmatpush3.bf16.msra.mxu1 %v849_v13  ;;  %v652_v19 = vld [vmem:[%s1134_s4] ss:$0 sm:$0xff]  ;;  %p905_p2 = scmp.lt.s32.totalorder %s903_s8, %s899_s30 }
  0x12   :  { %756 = vmatmul.mubr.msk.f32.gmra.mrb[6].mxu1 %vm64_vm0, %v49_v18  ;;  %854 = vmatprep.subr.bf16.mxu1 %v853_v17  ;;  %v926_v18 = vmov 0  }
  0x13   :  { %758 = vmatprep.mubr.msk.f32.mxu1 %vm64_vm0, %v50_v21  ;;  %898 = vset.pattern.permute.xlu0 %v926_v18  ;;  %p906_p3 = por %p905_p2, %p904_p1 }
  0x15   :  { %856 = vmatpush3.bf16.msra.mxu1 %v853_v17  ;;  %v41_v17 = vld [vmem:[#allocation2] sm:$0x1]  ;;  %p907_p4 = pnand %p906_p3, %p900_p0 }
  0x16   :  { %759 = vmatmul.mubr.msk.f32.gmra.mrb[8].mxu1 %vm64_vm0, %v51_v23  ;;  %858 = vmatprep.subr.bf16.mxu1 %v857_v22 }
  0x17   :  { %761 = vmatprep.mubr.msk.f32.mxu1 %vm64_vm0, %v52_v24  ;;  %492 = vperm.xlu0 %898, %v41_v17  }
  0x19   :  { %860 = vmatpush3.bf16.msra.mxu1 %v857_v22 }
  0x1a   :  { %762 = vmatmul.mubr.msk.f32.gmra.mrb[10].mxu1 %vm64_vm0, %v53_v25 }
  0x1b   :  { %764 = vmatprep.mubr.msk.f32.mxu1 %vm64_vm0, %v54_v26 }
  0x1e   :  { %765 = vmatmul.mubr.msk.f32.gmra.mrb[12].mxu1 %vm64_vm0, %v55_v27 }
  0x1f   :  { %767 = vmatprep.mubr.msk.f32.mxu1 %vm64_vm0, %v56_v28 }
  0x22   :  { %768 = vmatmul.mubr.msk.f32.gmra.mrb[14].mxu1 %vm64_vm0, %v57_v29 }
  0x96   :  { %v493_v18 = vpop.permute.xlu0 %492 }
  0xd9   :  { %v748_v31 = vpop.f32.mrb[0].mxu1 }
  0xda   :  { %v185_v32 = vadd.f32 %v748_v31, %v635_v30  ;;  %v179_v33 = vpop.f32.mrb[1].mxu1 }
  0xdb   :  { %v180_v34 = vadd.f32 %v635_v30, %v179_v33 }
  0xdc   :  { %v259_v37 = vmax.f32 %v185_v32, 0.0 }
  0xdd   :  { %v258_v35 = vmax.f32 %v180_v34, 0.0  ;;  %v751_v36 = vpop.f32.mrb[2].mxu1 }
  0xde   :  { %v195_v38 = vadd.f32 %v751_v36, %v635_v30  ;;  %v189_v39 = vpop.f32.mrb[3].mxu1 }
  0xdf   :  { %v190_v40 = vadd.f32 %v635_v30, %v189_v39  ;;  %786 = vmatprep.mubr.msk.f32.mxu1 %vm280_vm1, %v258_v35 }
  0xe0   :  { %v261_v41 = vmax.f32 %v195_v38, 0.0  ;;  %787 = vmatmul.mubr.msk.f32.vlgmr.msra.gmra.mrb[16].mxu1 %vm280_vm1, %v259_v37 }
  0xe1   :  { %v260_v42 = vmax.f32 %v190_v40, 0.0  ;;  %v754_v43 = vpop.f32.mrb[4].mxu1 }
  0xe2   :  { %v205_v44 = vadd.f32 %v754_v43, %v635_v30  ;;  %v199_v45 = vpop.f32.mrb[5].mxu1 }
  0xe3   :  { %789 = vmatprep.mubr.msk.f32.mxu1 %vm280_vm1, %v260_v42  ;;  %v200_v46 = vadd.f32 %v635_v30, %v199_v45 }
  0xe4   :  { %790 = vmatmul.mubr.msk.f32.gmra.mrb[18].mxu1 %vm280_vm1, %v261_v41  ;;  %v263_v47 = vmax.f32 %v205_v44, 0.0 }
  0xe5   :  { %v262_v48 = vmax.f32 %v200_v46, 0.0  ;;  %v757_v49 = vpop.f32.mrb[6].mxu1 }
  0xe6   :  { %v215_v50 = vadd.f32 %v757_v49, %v635_v30  ;;  %v209_v51 = vpop.f32.mrb[7].mxu1 }
  0xe7   :  { %792 = vmatprep.mubr.msk.f32.mxu1 %vm280_vm1, %v262_v48  ;;  %v210_v52 = vadd.f32 %v635_v30, %v209_v51 }
  0xe8   :  { %793 = vmatmul.mubr.msk.f32.gmra.mrb[20].mxu1 %vm280_vm1, %v263_v47  ;;  %v265_v53 = vmax.f32 %v215_v50, 0.0 }
  0xe9   :  { %v264_v54 = vmax.f32 %v210_v52, 0.0  ;;  %v760_v55 = vpop.f32.mrb[8].mxu1 }
  0xea   :  { %v225_v56 = vadd.f32 %v760_v55, %v635_v30  ;;  %v219_v57 = vpop.f32.mrb[9].mxu1 }
  0xeb   :  { %795 = vmatprep.mubr.msk.f32.mxu1 %vm280_vm1, %v264_v54  ;;  %v220_v58 = vadd.f32 %v635_v30, %v219_v57 }
  0xec   :  { %796 = vmatmul.mubr.msk.f32.gmra.mrb[22].mxu1 %vm280_vm1, %v265_v53  ;;  %v267_v59 = vmax.f32 %v225_v56, 0.0 }
  0xed   :  { %v266_v60 = vmax.f32 %v220_v58, 0.0  ;;  %v763_v61 = vpop.f32.mrb[10].mxu1 }
  0xee   :  { %v235_v62 = vadd.f32 %v763_v61, %v635_v30  ;;  %v229_v63 = vpop.f32.mrb[11].mxu1 }
  0xef   :  { %798 = vmatprep.mubr.msk.f32.mxu1 %vm280_vm1, %v266_v60  ;;  %v230_v0 = vadd.f32 %v635_v30, %v229_v63 }
  0xf0   :  { %799 = vmatmul.mubr.msk.f32.gmra.mrb[24].mxu1 %vm280_vm1, %v267_v59  ;;  %v269_v1 = vmax.f32 %v235_v62, 0.0 }
  0xf1   :  { %v268_v2 = vmax.f32 %v230_v0, 0.0  ;;  %v766_v3 = vpop.f32.mrb[12].mxu1 }
  0xf2   :  { %v245_v4 = vadd.f32 %v766_v3, %v635_v30  ;;  %v239_v5 = vpop.f32.mrb[13].mxu1 }
  0xf3   :  { %801 = vmatprep.mubr.msk.f32.mxu1 %vm280_vm1, %v268_v2  ;;  %v240_v6 = vadd.f32 %v635_v30, %v239_v5 }
  0xf4   :  { %802 = vmatmul.mubr.msk.f32.gmra.mrb[26].mxu1 %vm280_vm1, %v269_v1  ;;  %v271_v7 = vmax.f32 %v245_v4, 0.0 }
  0xf5   :  { %v270_v8 = vmax.f32 %v240_v6, 0.0  ;;  %v769_v9 = vpop.f32.mrb[14].mxu1 }
  0xf6   :  { %v255_v10 = vadd.f32 %v769_v9, %v635_v30  ;;  %v249_v11 = vpop.f32.mrb[15].mxu1 }
  0xf7   :  { %804 = vmatprep.mubr.msk.f32.mxu1 %vm280_vm1, %v270_v8  ;;  %v250_v12 = vadd.f32 %v635_v30, %v249_v11 }
  0xf8   :  { %805 = vmatmul.mubr.msk.f32.gmra.mrb[28].mxu1 %vm280_vm1, %v271_v7  ;;  %v273_v13 = vmax.f32 %v255_v10, 0.0 }
  0xf9   :  { %v272_v14 = vmax.f32 %v250_v12, 0.0 }
  0xfb   :  { %807 = vmatprep.mubr.msk.f32.mxu1 %vm280_vm1, %v272_v14  ;;  %v495_v14 = vlaneseq }
  0xfc   :  { %808 = vmatmul.mubr.msk.f32.gmra.mrb[30].mxu1 %vm280_vm1, %v273_v13  ;;  %v38_v13 = vld [vmem:[%s1135_s5] sm:$0x1] }
  0xfd   :  { %v496_v16 = vshrl.u32 %v495_v14, 7 }
  0xff   :  { %v497_v17 = vsub.s32 0, %v496_v16 }
 0x1b3   :  { %v788_v20 = vpop.f32.mrb[16].mxu1 }
 0x1b4   :  { %v401_v21 = vadd.f32 %v788_v20, %v652_v19  ;;  %v395_v22 = vpop.f32.mrb[17].mxu1 }
 0x1b5   :  { %v396_v23 = vadd.f32 %v652_v19, %v395_v22 }
 0x1b6   :  { %v475_v24 = vmax.f32 %v401_v21, 0.0 }
 0x1b7   :  { %v474_v25 = vmax.f32 %v396_v23, 0.0  ;;  %v791_v26 = vpop.f32.mrb[18].mxu1 }
 0x1b8   :  { %v411_v27 = vadd.f32 %v791_v26, %v652_v19  ;;  %v405_v28 = vpop.f32.mrb[19].mxu1 }
 0x1b9   :  { %v862_v30 = vpack.c.bf16 %v475_v24, %v474_v25  ;;  %v406_v31 = vadd.f32 %v652_v19, %v405_v28 }
 0x1ba   :  { %v477_v32 = vmax.f32 %v411_v27, 0.0 }
 0x1bb   :  { %v476_v33 = vmax.f32 %v406_v31, 0.0  ;;  %864 = vmatpush3.bf16.xpose.msk.msra.mxu0 %vm1087_vm3, %v862_v30  ;;  %v794_v34 = vpop.f32.mrb[20].mxu1 }
 0x1bc   :  { %v421_v35 = vadd.f32 %v794_v34, %v652_v19  ;;  %v415_v36 = vpop.f32.mrb[21].mxu1  ;;  %865 = vmatprep.subr.bf16.mxu0 %v923_v15 }
 0x1bd   :  { %v866_v37 = vpack.c.bf16 %v477_v32, %v476_v33  ;;  %v416_v38 = vadd.f32 %v652_v19, %v415_v36 }
 0x1be   :  { %v479_v39 = vmax.f32 %v421_v35, 0.0 }
 0x1bf   :  { %v478_v40 = vmax.f32 %v416_v38, 0.0  ;;  %v797_v41 = vpop.f32.mrb[22].mxu1 }
 0x1c0   :  { %v431_v42 = vadd.f32 %v797_v41, %v652_v19  ;;  %v425_v43 = vpop.f32.mrb[23].mxu1 }
 0x1c1   :  { %v870_v44 = vpack.c.bf16 %v479_v39, %v478_v40  ;;  %v426_v45 = vadd.f32 %v652_v19, %v425_v43 }
 0x1c2   :  { %v481_v46 = vmax.f32 %v431_v42, 0.0 }
 0x1c3   :  { %868 = vmatpush3.bf16.xpose.msk.msra.mxu0 %vm1087_vm3, %v866_v37  ;;  %v480_v47 = vmax.f32 %v426_v45, 0.0  ;;  %v800_v48 = vpop.f32.mrb[24].mxu1 }
 0x1c4   :  { %869 = vmatprep.subr.bf16.mxu0 %v923_v15  ;;  %v441_v49 = vadd.f32 %v800_v48, %v652_v19  ;;  %v435_v50 = vpop.f32.mrb[25].mxu1 }
 0x1c5   :  { %v874_v51 = vpack.c.bf16 %v481_v46, %v480_v47  ;;  %v436_v52 = vadd.f32 %v652_v19, %v435_v50 }
 0x1c6   :  { %v483_v53 = vmax.f32 %v441_v49, 0.0 }
 0x1c7   :  { %v482_v54 = vmax.f32 %v436_v52, 0.0  ;;  %v803_v55 = vpop.f32.mrb[26].mxu1 }
 0x1c8   :  { %v451_v56 = vadd.f32 %v803_v55, %v652_v19  ;;  %v445_v57 = vpop.f32.mrb[27].mxu1 }
 0x1c9   :  { %v878_v58 = vpack.c.bf16 %v483_v53, %v482_v54  ;;  %v446_v59 = vadd.f32 %v652_v19, %v445_v57 }
 0x1ca   :  { %v485_v60 = vmax.f32 %v451_v56, 0.0 }
 0x1cb   :  { %872 = vmatpush3.bf16.xpose.msk.msra.mxu0 %vm1087_vm3, %v870_v44  ;;  %v484_v61 = vmax.f32 %v446_v59, 0.0  ;;  %v806_v62 = vpop.f32.mrb[28].mxu1 }
 0x1cc   :  { %873 = vmatprep.subr.bf16.mxu0 %v923_v15  ;;  %v461_v63 = vadd.f32 %v806_v62, %v652_v19  ;;  %v455_v0 = vpop.f32.mrb[29].mxu1 }
 0x1cd   :  { %v882_v1 = vpack.c.bf16 %v485_v60, %v484_v61  ;;  %v456_v2 = vadd.f32 %v652_v19, %v455_v0 }
 0x1ce   :  { %v487_v3 = vmax.f32 %v461_v63, 0.0 }
 0x1cf   :  { %v486_v4 = vmax.f32 %v456_v2, 0.0  ;;  %v809_v5 = vpop.f32.mrb[30].mxu1 }
 0x1d0   :  { %v471_v6 = vadd.f32 %v809_v5, %v652_v19  ;;  %v465_v7 = vpop.f32.mrb[31].mxu1 }
 0x1d1   :  { %v886_v8 = vpack.c.bf16 %v487_v3, %v486_v4  ;;  %v466_v9 = vadd.f32 %v652_v19, %v465_v7  ;;  %v498_v19 = vrot.slane %v493_v18, %v497_v17 }
 0x1d2   :  { %v489_v10 = vmax.f32 %v471_v6, 0.0 }
 0x1d3   :  { %876 = vmatpush3.bf16.xpose.msk.msra.mxu0 %vm1087_vm3, %v874_v51  ;;  %v488_v11 = vmax.f32 %v466_v9, 0.0 }
 0x1d4   :  { %877 = vmatprep.subr.bf16.mxu0 %v923_v15 }
 0x1d5   :  { %v890_v12 = vpack.c.bf16 %v489_v10, %v488_v11 }
 0x1db   :  { %880 = vmatpush3.bf16.xpose.msk.msra.mxu0 %vm1087_vm3, %v878_v58 }
 0x1dc   :  { %881 = vmatprep.subr.bf16.mxu0 %v923_v15 }
 0x1e3   :  { %884 = vmatpush3.bf16.xpose.msk.msra.mxu0 %vm1087_vm3, %v882_v1 }
 0x1e4   :  { %885 = vmatprep.subr.bf16.mxu0 %v923_v15 }
 0x1eb   :  { %888 = vmatpush3.bf16.xpose.msk.msra.mxu0 %vm1087_vm3, %v886_v8 }
 0x1ec   :  { %889 = vmatprep.subr.bf16.mxu0 %v923_v15 }
 0x1f3   :  { %892 = vmatpush3.bf16.xpose.msk.msra.mxu0 %vm1087_vm3, %v890_v12 }
 0x1fa   :  { %843 = vmatmul.mubr.msk.f32.vlgmr.msra.gmra.mrb[0].mxu0 %vm280_vm1, %v38_v13 }
 0x2cd   :  { %v616_v20 = vpop.f32.mrb[0].mxu0 }
 0x2ce   :  { %v617_v21 = vadd.f32 %v616_v20, %v498_v19  ;;  %v844_v22 = vpop.f32.mrb[1].mxu0 }
 0x2d0   :  { %620 = vst [vmem:[#allocation3] sm:$0x1] %v617_v21 }
 0x2d1   :  { %910 = shalt.err (!%p907_p4)
}
 0x2d2   :  { %s911_s10 = scalar_lea.hbm %s1137_s7, 16 }
 0x2d3   :  { %p912_p5 = scmp.ne.s32.totalorder %s1137_s7, %s911_s10  ;;  %p915_p6 = scmp.lt.u32.totalorder %s911_s10, %s1137_s7 }
 0x2d5   :  { %p917_p7 = pnand %p915_p6, %p912_p5 }
 0x2d7   :  { %920 = shalt.err (!%p917_p7)
}
 0x2d8   :  { %630 = dma.vmem_to_hbm [thread:$0]  %s628_s29, 16, %s1137_s7, [#allocation4]  }
 0x2d9   :  { %921 = dma.done.wait [#allocation4], 16  }
 0x2da   :  { %922 = vsyncadd [#allocation4], 4294967280 }
 0x2db   :  { %634 = vsyncpa [#allocation4], 1 }

</bundles_post_ra>
